<compile_context>
chip_gen: v5e
topology: v5e:2x2
jax: 0.10.0
libtpu: 0.0.40
codegen_flags: <defaults>
</compile_context>

<pallas_src>
import functools

import jax
import jax.numpy as jnp
from jax.experimental import pallas as pl
from jax.experimental.pallas import tpu as pltpu

_HALO = 8                   # sublane-aligned halo rows on each side of a seq tile (K <= 9)
_MIB = 1024 * 1024


def _round_up(x, m):
    return (x + m - 1) // m * m


def _divisor_candidates(total, cap, quantum):
    """Divisors of `total` that are multiples of `quantum`, descending.  `total` itself is
    preferred (dimension not tiled at all) whenever it is within `cap`."""
    cands = []
    if total <= cap:
        cands.append(total)
    t = (min(cap, total) // quantum) * quantum
    while t >= quantum:
        if total % t == 0 and t != total:
            cands.append(t)
        t -= quantum
    if not cands:            # e.g. total not divisible by quantum and larger than cap
        cands.append(total)
    return cands


def _seq_tile_candidates(L, tl_max):
    """Sequence-tile candidates (multiples of 8), descending.  TL need not divide L — the
    wrapper pads L up to a multiple of the chosen TL, which avoids awkward tiny tiles."""
    top = max(8, min(_round_up(tl_max, 8), _round_up(L, 8)))
    cands, t = [], top
    while t >= 8:
        cands.append(t)
        t = _round_up(t // 2, 8) if t > 8 else 0
    return cands


def _choose_tiles(L, Hin, Hout_p, K, itemsize, tl_max, tn_max, thin_max, budget):
    tl_cands = _seq_tile_candidates(L, tl_max)
    th_cands = _divisor_candidates(Hin, thin_max, 128)
    tn_cands = _divisor_candidates(Hout_p, tn_max, 128)

    def footprint(tl, th, tn):
        db = itemsize
        x_b = 2 * (tl + 2 * _HALO) * th * db               # x tile + 2 halos, double-buffered
        w_b = 2 * K * th * tn * db + 2 * _HALO * tn * 4    # weight + (8,128)-padded bias
        o_b = 2 * tl * tn * db
        acc_b = (tl * tn * 4) if th != Hin else (8 * 128 * 4)
        win_b = (tl + 2 * _HALO) * th * db
        return x_b + w_b + o_b + acc_b + win_b

    # Preference order (perf review): (1) nK == 1 so the weight block is constant across
    # the whole sequence sweep, (2) widest lane-dense TN (ideally Hout_p, so x streams
    # from HBM exactly once), (3) longest sequence tile.
    for th in th_cands:
        for tn in tn_cands:
            for tl in tl_cands:
                if footprint(tl, th, tn) <= budget:
                    return tl, th, tn, footprint(tl, th, tn)
    tl, th, tn = tl_cands[-1], th_cands[-1], tn_cands[-1]
    return tl, th, tn, footprint(tl, th, tn)


def _conv_kernel(x_ref, lh_ref, rh_ref, w_ref, b_ref, o_ref, acc_ref, win_ref,
                 *, kernel_size, pad_l, tl, single_hin_step):
    """One (batch, Hout-tile, seq-tile, Hin-tile) grid step.

    x_ref  : [1, TL, TH]   current sequence tile
    lh_ref : [1, 8,  TH]   8 rows immediately before the tile (left halo, clamped)
    rh_ref : [1, 8,  TH]   8 rows immediately after the tile (right halo, clamped)
    w_ref  : [K, TH, TN]   weight slice (transposed Conv1d weight)
    b_ref  : [1, TN]       bias slice (f32)
    o_ref  : [1, TL, TN]   output tile
    acc_ref: f32 scratch   carried across the Hin reduction axis (unused when nK == 1)
    win_ref: [TL+16, TH]   haloed input window scratch
    """
    l, nl = pl.program_id(2), pl.num_programs(2)

    # Assemble [left halo | tile | right halo] in VMEM: one aligned TLxTH store plus two
    # 8xTH stores.  Boundary halos (clamped to an in-range block by the index_map) are
    # replaced with zeros via selects, reproducing nn.ConstantPad1d exactly and never
    # propagating NaN/Inf from the clamped block.
    win_ref[pl.ds(_HALO, tl), :] = x_ref[0]
    lh = lh_ref[0]
    win_ref[pl.ds(0, _HALO), :] = jnp.where(l > 0, lh, jnp.zeros_like(lh))
    rh = rh_ref[0]
    win_ref[pl.ds(_HALO + tl, _HALO), :] = jnp.where(l < nl - 1, rh, jnp.zeros_like(rh))

    # K per-tap MXU matmuls [TL, TH] x [TH, TN] fused into ONE f32 partial sum: a single
    # accumulator / output RMW per Hin step instead of K of them (vst-slot relief).  The
    # sublane realignment of each shifted tap rides the load path / XLU, not the vst slot.
    partial = jnp.dot(win_ref[pl.ds(_HALO - pad_l, tl), :], w_ref[0],
                      preferred_element_type=jnp.float32)
    for k in range(1, kernel_size):
        partial = partial + jnp.dot(win_ref[pl.ds(_HALO - pad_l + k, tl), :], w_ref[k],
                                    preferred_element_type=jnp.float32)

    if single_hin_step:
        # nK == 1 fast path (the default): no accumulator traffic at all.
        o_ref[0, :, :] = (partial + b_ref[...]).astype(o_ref.dtype)
    else:
        kin, nkin = pl.program_id(3), pl.num_programs(3)

        @pl.when(kin == 0)
        def _():
            acc_ref[...] = partial

        @pl.when(kin > 0)
        def _():
            acc_ref[...] += partial

        @pl.when(kin == nkin - 1)
        def _():
            o_ref[0, :, :] = (acc_ref[...] + b_ref[...]).astype(o_ref.dtype)


def conv_forward(x, weight, bias, *, kernel_size, pad_type,
                 tl_max=512, tn_max=2048, thin_max=2048,
                 compute_dtype=None, x_buffer_count=2,
                 vmem_budget_bytes=40 * _MIB, vmem_limit_bytes=None):
    """Equivalent of Conv.forward.

    x:      [B, L, H_in]
    weight: [H_out, H_in, K]   (PyTorch Conv1d layout)
    bias:   [H_out]
    returns [B, L, H_out]

    vmem_budget_bytes: 40 MiB default is safe on all generations (v7x has 64 MiB VMEM);
    v5e/v6e (128 MiB VMEM) can raise it to ~96 MiB for larger resident weight blocks.
    compute_dtype=jnp.bfloat16 halves HBM/VMEM traffic (f32 accumulation is kept).
    x_buffer_count=3 deepens the x-tile pipeline (useful on v5e if input DMA is exposed).
    """
    B, L, Hin = x.shape
    Hout = weight.shape[0]
    K = kernel_size
    if K - 1 > _HALO:
        raise NotImplementedError("kernel_size must be <= 9 (8-row halo)")
    pad_l = K - 1 if pad_type == "left" else K // 2

    out_dtype = x.dtype
    if compute_dtype is not None:
        x = x.astype(compute_dtype)
        weight = weight.astype(compute_dtype)

    # ---- one-time wrapper glue ----
    Hout_p = _round_up(Hout, 128)                    # lane-dense output (no masked vst)
    w = jnp.transpose(weight, (2, 1, 0))             # [K, Hin, Hout]
    if Hout_p != Hout:
        w = jnp.pad(w, ((0, 0), (0, 0), (0, Hout_p - Hout)))
        bias = jnp.pad(bias, (0, Hout_p - Hout))
    b2 = bias.reshape(1, Hout_p).astype(jnp.float32)

    TL, TH, TN, fp = _choose_tiles(L, Hin, Hout_p, K, jnp.dtype(x.dtype).itemsize,
                                   tl_max, tn_max, thin_max, vmem_budget_bytes)
    L_p = _round_up(L, TL)
    if L_p != L:
        # Zero tail rows also double as right-pad rows for pad_type='both'.
        x = jnp.pad(x, ((0, 0), (0, L_p - L), (0, 0)))

    nL, nN, nK = L_p // TL, Hout_p // TN, Hin // TH
    hb = TL // _HALO                                 # 8-row blocks per sequence tile
    last_hblk = L_p // _HALO - 1
    if vmem_limit_bytes is None:
        vmem_limit_bytes = max(32 * _MIB, fp + 8 * _MIB)

    kernel = functools.partial(_conv_kernel, kernel_size=K, pad_l=pad_l, tl=TL,
                               single_hin_step=(nK == 1))
    acc_shape = (TL, TN) if nK > 1 else (8, 128)     # dummy when the fast path is taken

    x_spec_kwargs = {}
    if x_buffer_count != 2:
        x_spec_kwargs = dict(pipeline_mode=pl.Buffered(x_buffer_count))

    out = pl.pallas_call(
        kernel,
        out_shape=jax.ShapeDtypeStruct((B, L_p, Hout_p), out_dtype),
        grid_spec=pltpu.PrefetchScalarGridSpec(
            num_scalar_prefetch=0,
            # Hout tiles outer, sequence tiles inner: with nK == 1 the [K, Hin, TN] weight
            # block index is constant across the whole (b, l) sweep (fetched nN times in
            # total); with nN == 1 activations are streamed from HBM exactly once.
            grid=(B, nN, nL, nK),
            in_specs=[
                # current sequence tile
                pl.BlockSpec((1, TL, TH), lambda b, n, l, k: (b, l, k), **x_spec_kwargs),
                # 8-row left halo (previous tile's tail); clamped at l == 0, zeroed in-kernel
                pl.BlockSpec((1, _HALO, TH),
                             lambda b, n, l, k: (b, jnp.maximum(l * hb - 1, 0), k)),
                # 8-row right halo (next tile's head); clamped at last tile, zeroed in-kernel
                pl.BlockSpec((1, _HALO, TH),
                             lambda b, n, l, k: (b, jnp.minimum((l + 1) * hb, last_hblk), k)),
                # weight [K, TH, TN]
                pl.BlockSpec((K, TH, TN), lambda b, n, l, k: (0, k, n)),
                # bias [1, TN]
                pl.BlockSpec((1, TN), lambda b, n, l, k: (0, n)),
            ],
            out_specs=pl.BlockSpec((1, TL, TN), lambda b, n, l, k: (b, l, n)),
            scratch_shapes=[
                pltpu.VMEM(acc_shape, jnp.float32),          # f32 accumulator (nK > 1 only)
                pltpu.VMEM((TL + 2 * _HALO, TH), x.dtype),   # haloed input window
            ],
        ),
        compiler_params=pltpu.CompilerParams(
            # On v7x (2 TensorCores) the product B*nN*nL should be >= 2 for load balance.
            dimension_semantics=("parallel", "parallel", "parallel", "arbitrary"),
            vmem_limit_bytes=int(vmem_limit_bytes),
        ),
    )(x, x, x, w, b2)

    return out[:, :L, :Hout]


def _reference(x, weight, bias, *, kernel_size, pad_type):
    """Pure-JAX reference mirroring the PyTorch module exactly."""
    K = kernel_size
    if pad_type == "left":
        pad_l, pad_r = K - 1, 0
    else:
        pad_l, pad_r = K // 2, (K - 1) // 2
    x_pad = jnp.pad(x, ((0, 0), (pad_l, pad_r), (0, 0)))
    L = x.shape[1]
    acc = jnp.zeros((x.shape[0], L, weight.shape[0]), jnp.float32) \
        + bias[None, None, :].astype(jnp.float32)
    for k in range(K):
        acc = acc + jnp.einsum("blh,oh->blo",
                               x_pad[:, k:k + L, :].astype(jnp.float32),
                               weight[:, :, k].astype(jnp.float32))
    return acc.astype(x.dtype)


if __name__ == "__main__":
    key = jax.random.PRNGKey(0)
    keys = jax.random.split(key, 9)

    # --- test 1: module-sized small shapes, causal ('left') padding, nL=nN=nK=1 -------
    B, L, Hin, Hout, K = 2, 8, 32, 32, 3
    x = jax.random.normal(keys[0], (B, L, Hin), dtype=jnp.float32)
    bound = 1.0 / ((Hin * K) ** 0.5)   # mimics PyTorch Conv1d fan-in init
    weight = jax.random.uniform(keys[1], (Hout, Hin, K), jnp.float32, -bound, bound)
    bias = jax.random.uniform(keys[2], (Hout,), jnp.float32, -bound, bound)
    out = jax.block_until_ready(conv_forward(x, weight, bias, kernel_size=K, pad_type="left"))
    ref = _reference(x, weight, bias, kernel_size=K, pad_type="left")
    assert out.shape == (B, L, Hout)
    assert jnp.allclose(out, ref, atol=1e-4, rtol=1e-4)

    # --- test 2: multi-tile path: seq halos (nL=4), Hin reduction (nK=2), Hout padding --
    B2, L2, Hin2, Hout2, K2 = 1, 32, 256, 64, 4
    x2 = jax.random.normal(keys[3], (B2, L2, Hin2), dtype=jnp.float32)
    bound2 = 1.0 / ((Hin2 * K2) ** 0.5)
    w2 = jax.random.uniform(keys[4], (Hout2, Hin2, K2), jnp.float32, -bound2, bound2)
    b2 = jax.random.uniform(keys[5], (Hout2,), jnp.float32, -bound2, bound2)
    out2 = jax.block_until_ready(conv_forward(x2, w2, b2, kernel_size=K2, pad_type="both",
                                              tl_max=8, tn_max=128, thin_max=128))
    ref2 = _reference(x2, w2, b2, kernel_size=K2, pad_type="both")
    assert out2.shape == (B2, L2, Hout2)
    assert jnp.allclose(out2, ref2, atol=1e-3, rtol=1e-3)

    # --- test 3: ragged L (padded tail), nL>1 with the nK==1 accumulator-free fast path -
    B3, L3, Hin3, Hout3, K3 = 2, 40, 128, 96, 3
    x3 = jax.random.normal(keys[6], (B3, L3, Hin3), dtype=jnp.float32)
    bound3 = 1.0 / ((Hin3 * K3) ** 0.5)
    w3 = jax.random.uniform(keys[7], (Hout3, Hin3, K3), jnp.float32, -bound3, bound3)
    b3 = jax.random.uniform(keys[8], (Hout3,), jnp.float32, -bound3, bound3)
    out3 = jax.block_until_ready(conv_forward(x3, w3, b3, kernel_size=K3, pad_type="both",
                                              tl_max=16))
    ref3 = _reference(x3, w3, b3, kernel_size=K3, pad_type="both")
    assert out3.shape == (B3, L3, Hout3)
    assert jnp.allclose(out3, ref3, atol=1e-3, rtol=1e-3)

    # --- test 4: bf16 MXU operands (f32 accumulation), default large-tile path ---------
    xb = x2.astype(jnp.bfloat16).astype(jnp.float32)   # pre-round so the f32 reference
    wb = w2.astype(jnp.bfloat16).astype(jnp.float32)   # sees identical operand values
    out4 = jax.block_until_ready(conv_forward(xb, wb, b2, kernel_size=K2, pad_type="left",
                                              compute_dtype=jnp.bfloat16))
    ref4 = _reference(xb, wb, b2, kernel_size=K2, pad_type="left")
    assert out4.shape == (B2, L2, Hout2)
    assert jnp.allclose(out4, ref4, atol=5e-3, rtol=5e-3)

    print("KERNEL_OK")
</pallas_src>

<mosaic_0001>
module attributes {stable_mosaic.version = 11 : i64} {
  func.func @_conv_kernel(%arg0: i32, %arg1: i32, %arg2: i32, %arg3: i32, %arg4: memref<1x8x32xf32, #tpu.memory_space<vmem>>, %arg5: memref<1x8x32xf32, #tpu.memory_space<vmem>>, %arg6: memref<1x8x32xf32, #tpu.memory_space<vmem>>, %arg7: memref<3x32x128xf32, #tpu.memory_space<vmem>>, %arg8: memref<1x128xf32, #tpu.memory_space<vmem>>, %arg9: memref<1x8x128xf32, #tpu.memory_space<vmem>>, %arg10: memref<8x128xf32, #tpu.memory_space<vmem>>, %arg11: memref<24x32xf32, #tpu.memory_space<vmem>>) attributes {dimension_semantics = [#tpu.dimension_semantics<parallel>, #tpu.dimension_semantics<parallel>, #tpu.dimension_semantics<parallel>, #tpu.dimension_semantics<arbitrary>], iteration_bounds = array<i64: 2, 1, 1, 1>, scalar_prefetch = 0 : i64, scratch_operands = 2 : i64, tpu.core_type = #tpu.core_type<tc>, window_params = [{transform_indices = @transform_0, window_bounds = array<i64: 1, 8, 32>}, {transform_indices = @transform_1, window_bounds = array<i64: 1, 8, 32>}, {transform_indices = @transform_2, window_bounds = array<i64: 1, 8, 32>}, {transform_indices = @transform_3, window_bounds = array<i64: 3, 32, 128>}, {transform_indices = @transform_4, window_bounds = array<i64: 1, 128>}, {transform_indices = @transform_5, window_bounds = array<i64: 1, 8, 128>}]} {
    %c0 = arith.constant 0 : index
    %c0_0 = arith.constant 0 : index
    %c0_1 = arith.constant 0 : index
    %0 = vector.load %arg4[%c0, %c0_0, %c0_1] : memref<1x8x32xf32, #tpu.memory_space<vmem>>, vector<1x8x32xf32>
    %1 = vector.shape_cast %0 : vector<1x8x32xf32> to vector<8x32xf32>
    %c8 = arith.constant 8 : index
    %c0_2 = arith.constant 0 : index
    %2 = vector.load %arg11[%c8, %c0_2] : memref<24x32xf32, #tpu.memory_space<vmem>>, vector<8x32xf32>
    tpu.vector_store %arg11[%c8, %c0_2], %1 {strides = array<i32>} : memref<24x32xf32, #tpu.memory_space<vmem>>, vector<8x32xf32>,
    %c0_3 = arith.constant 0 : index
    %c0_4 = arith.constant 0 : index
    %c0_5 = arith.constant 0 : index
    %3 = vector.load %arg5[%c0_3, %c0_4, %c0_5] : memref<1x8x32xf32, #tpu.memory_space<vmem>>, vector<1x8x32xf32>
    %4 = vector.shape_cast %3 : vector<1x8x32xf32> to vector<8x32xf32>
    %c0_i32 = arith.constant 0 : i32
    %5 = arith.cmpi sgt, %arg2, %c0_i32 : i32
    %cst = arith.constant 0.000000e+00 : f32
    %6 = vector.broadcast %cst : f32 to vector<8x32xf32>
    %7 = arith.select %5, %4, %6 : vector<8x32xf32>
    %c0_6 = arith.constant 0 : index
    %c0_7 = arith.constant 0 : index
    %8 = vector.load %arg11[%c0_6, %c0_7] : memref<24x32xf32, #tpu.memory_space<vmem>>, vector<8x32xf32>
    tpu.vector_store %arg11[%c0_6, %c0_7], %7 {strides = array<i32>} : memref<24x32xf32, #tpu.memory_space<vmem>>, vector<8x32xf32>,
    %c0_8 = arith.constant 0 : index
    %c0_9 = arith.constant 0 : index
    %c0_10 = arith.constant 0 : index
    %9 = vector.load %arg6[%c0_8, %c0_9, %c0_10] : memref<1x8x32xf32, #tpu.memory_space<vmem>>, vector<1x8x32xf32>
    %10 = vector.shape_cast %9 : vector<1x8x32xf32> to vector<8x32xf32>
    %c0_i32_11 = arith.constant 0 : i32
    %11 = arith.cmpi slt, %arg2, %c0_i32_11 : i32
    %cst_12 = arith.constant 0.000000e+00 : f32
    %12 = vector.broadcast %cst_12 : f32 to vector<8x32xf32>
    %13 = arith.select %11, %10, %12 : vector<8x32xf32>
    %c16 = arith.constant 16 : index
    %c0_13 = arith.constant 0 : index
    %14 = vector.load %arg11[%c16, %c0_13] : memref<24x32xf32, #tpu.memory_space<vmem>>, vector<8x32xf32>
    tpu.vector_store %arg11[%c16, %c0_13], %13 {strides = array<i32>} : memref<24x32xf32, #tpu.memory_space<vmem>>, vector<8x32xf32>,
    %c6 = arith.constant 6 : index
    %c0_14 = arith.constant 0 : index
    %15 = vector.load %arg11[%c6, %c0_14] : memref<24x32xf32, #tpu.memory_space<vmem>>, vector<8x32xf32>
    %c0_15 = arith.constant 0 : index
    %c0_16 = arith.constant 0 : index
    %c0_17 = arith.constant 0 : index
    %16 = vector.load %arg7[%c0_15, %c0_16, %c0_17] : memref<3x32x128xf32, #tpu.memory_space<vmem>>, vector<1x32x128xf32>
    %17 = vector.shape_cast %16 : vector<1x32x128xf32> to vector<32x128xf32>
    %cst_18 = arith.constant dense<0.000000e+00> : vector<8x128xf32>
    %18 = tpu.matmul %15, %17, %cst_18 {dimension_numbers = #tpu.dot_dimension_numbers<[1], [0], [0], [1], [0, 0, 1, 1], [], []>} : vector<8x32xf32>, vector<32x128xf32>, vector<8x128xf32> -> vector<8x128xf32>
    %c7 = arith.constant 7 : index
    %c0_19 = arith.constant 0 : index
    %19 = vector.load %arg11[%c7, %c0_19] : memref<24x32xf32, #tpu.memory_space<vmem>>, vector<8x32xf32>
    %c1 = arith.constant 1 : index
    %c0_20 = arith.constant 0 : index
    %c0_21 = arith.constant 0 : index
    %20 = vector.load %arg7[%c1, %c0_20, %c0_21] : memref<3x32x128xf32, #tpu.memory_space<vmem>>, vector<1x32x128xf32>
    %21 = vector.shape_cast %20 : vector<1x32x128xf32> to vector<32x128xf32>
    %cst_22 = arith.constant dense<0.000000e+00> : vector<8x128xf32>
    %22 = tpu.matmul %19, %21, %cst_22 {dimension_numbers = #tpu.dot_dimension_numbers<[1], [0], [0], [1], [0, 0, 1, 1], [], []>} : vector<8x32xf32>, vector<32x128xf32>, vector<8x128xf32> -> vector<8x128xf32>
    %23 = arith.addf %18, %22 : vector<8x128xf32>
    %c8_23 = arith.constant 8 : index
    %c0_24 = arith.constant 0 : index
    %24 = vector.load %arg11[%c8_23, %c0_24] : memref<24x32xf32, #tpu.memory_space<vmem>>, vector<8x32xf32>
    %c2 = arith.constant 2 : index
    %c0_25 = arith.constant 0 : index
    %c0_26 = arith.constant 0 : index
    %25 = vector.load %arg7[%c2, %c0_25, %c0_26] : memref<3x32x128xf32, #tpu.memory_space<vmem>>, vector<1x32x128xf32>
    %26 = vector.shape_cast %25 : vector<1x32x128xf32> to vector<32x128xf32>
    %cst_27 = arith.constant dense<0.000000e+00> : vector<8x128xf32>
    %27 = tpu.matmul %24, %26, %cst_27 {dimension_numbers = #tpu.dot_dimension_numbers<[1], [0], [0], [1], [0, 0, 1, 1], [], []>} : vector<8x32xf32>, vector<32x128xf32>, vector<8x128xf32> -> vector<8x128xf32>
    %28 = arith.addf %23, %27 : vector<8x128xf32>
    %c0_28 = arith.constant 0 : index
    %c0_29 = arith.constant 0 : index
    %29 = vector.load %arg8[%c0_28, %c0_29] : memref<1x128xf32, #tpu.memory_space<vmem>>, vector<1x128xf32>
    %30 = vector.broadcast %29 : vector<1x128xf32> to vector<8x128xf32>
    %31 = arith.addf %28, %30 : vector<8x128xf32>
    %c0_30 = arith.constant 0 : index
    %c0_31 = arith.constant 0 : index
    %c0_32 = arith.constant 0 : index
    %32 = vector.load %arg9[%c0_30, %c0_31, %c0_32] : memref<1x8x128xf32, #tpu.memory_space<vmem>>, vector<1x8x128xf32>
    %33 = vector.shape_cast %32 : vector<1x8x128xf32> to vector<8x128xf32>
    %34 = vector.shape_cast %31 : vector<8x128xf32> to vector<1x8x128xf32>
    tpu.vector_store %arg9[%c0_30, %c0_31, %c0_32], %34 {strides = array<i32>} : memref<1x8x128xf32, #tpu.memory_space<vmem>>, vector<1x8x128xf32>,
    return
  }
  func.func @transform_0(%arg0: i32, %arg1: i32, %arg2: i32, %arg3: i32) -> (i32, i32, i32) {
    %c0_i32 = arith.constant 0 : i32
    return %arg0, %arg2, %arg3 : i32, i32, i32
  }
  func.func @transform_1(%arg0: i32, %arg1: i32, %arg2: i32, %arg3: i32) -> (i32, i32, i32) {
    %c1_i32 = arith.constant 1 : i32
    %0 = arith.muli %arg2, %c1_i32 : i32
    %c1_i32_0 = arith.constant 1 : i32
    %1 = arith.subi %0, %c1_i32_0 : i32
    %c0_i32 = arith.constant 0 : i32
    %2 = arith.maxsi %1, %c0_i32 : i32
    %c0_i32_1 = arith.constant 0 : i32
    return %arg0, %2, %arg3 : i32, i32, i32
  }
  func.func @transform_2(%arg0: i32, %arg1: i32, %arg2: i32, %arg3: i32) -> (i32, i32, i32) {
    %c1_i32 = arith.constant 1 : i32
    %0 = arith.addi %arg2, %c1_i32 : i32
    %c1_i32_0 = arith.constant 1 : i32
    %1 = arith.muli %0, %c1_i32_0 : i32
    %c0_i32 = arith.constant 0 : i32
    %2 = arith.minsi %1, %c0_i32 : i32
    %c0_i32_1 = arith.constant 0 : i32
    return %arg0, %2, %arg3 : i32, i32, i32
  }
  func.func @transform_3(%arg0: i32, %arg1: i32, %arg2: i32, %arg3: i32) -> (i32, i32, i32) {
    %c0_i32 = arith.constant 0 : i32
    %c0_i32_0 = arith.constant 0 : i32
    return %c0_i32, %arg3, %arg1 : i32, i32, i32
  }
  func.func @transform_4(%arg0: i32, %arg1: i32, %arg2: i32, %arg3: i32) -> (i32, i32) {
    %c0_i32 = arith.constant 0 : i32
    %c0_i32_0 = arith.constant 0 : i32
    return %c0_i32, %arg1 : i32, i32
  }
  func.func @transform_5(%arg0: i32, %arg1: i32, %arg2: i32, %arg3: i32) -> (i32, i32, i32) {
    %c0_i32 = arith.constant 0 : i32
    return %arg0, %arg2, %arg1 : i32, i32, i32
  }
}

</mosaic_0001>

<bundles_post_ra>
// kernel: tpu_custom_call.1
= control target key start
LH: loop header
LB: loop body
LE: loop exit
PB: predicated region body
PF: predicated region fallthrough
CT: control target
= control target key end

     0   :  { %s1280_s0 = inlined_call_operand.hbm [shape: f32[2,8,32], index: 0, kind: input, shape index: {}]   ;;  %s1281_s1 = inlined_call_operand.hbm [shape: f32[2,8,32], index: 1, kind: input, shape index: {}]   ;;  %s1282_s2 = inlined_call_operand.hbm [shape: f32[2,8,32], index: 2, kind: input, shape index: {}]   ;;  %s1283_s3 = inlined_call_operand.hbm [shape: f32[3,32,128], index: 3, kind: input, shape index: {}]   ;;  %s1284_s4 = inlined_call_operand.vmem [shape: f32[1,128], index: 4, kind: input, shape index: {}]   ;;  %s1285_s5 = inlined_call_operand.hbm [shape: f32[2,8,128], index: 5, kind: output, shape index: {}]  }
   0x1   :  { %1292 = sst [smem:[#allocation22_spill]] %s1281_s1 }
   0x2   :  { %1293 = sst [smem:[#allocation23_spill]] %s1283_s3 }
   0x3   :  { %10 = vsyncpa [#allocation5], 0 }
   0x4   :  { %12 = vsyncpa [#allocation5 + $0x1], 0 }
   0x5   :  { %13 = vsyncpa [#allocation8], 0 }
   0x6   :  { %15 = vsyncpa [#allocation8 + $0x1], 0 }
   0x7   :  { %16 = vsyncpa [#allocation11], 0 }
   0x8   :  { %17 = vsyncpa [#allocation6], 0 }
   0x9   :  { %19 = vsyncpa [#allocation6 + $0x1], 0  ;;  %s1079_s18 = smov 0   ;;  %s1081_s19 = smov 0  }
   0xa   :  { %s1083_s20 = smov 0   ;;  %s1085_s21 = smov 0  }
   0xb   :  { %s1087_s22 = smov 0   ;;  %s1089_s23 = smov 0  }
   0xc LB: > { %1294 = sst [smem:[#allocation17_spill]] %s1039_s22  ;;  %s1110_s24 = sadd.s32 4294967295, %s1043_s23   ;;  %s1043_s23 = sphi %s1089_s23, %s25_s23   ;;  %s1039_s22 = sphi %s1087_s22, %s1312_s22   ;;  %s1035_s21 = sphi %s1085_s21, %s1311_s21   ;;  %s1031_s20 = sphi %s1083_s20, %s1315_s20   ;;  %s1027_s19 = sphi %s1081_s19, %s1314_s19   ;;  %s1023_s18 = sphi %s1079_s18, %s1313_s18  }
   0xd   : > { %1295 = sst [smem:[#allocation18_spill]] %s1043_s23  ;;  %s722_s25 = sadd.s32 4294967294, %s1043_s23  }
   0xe   : > { %s51_s26 = sadd.s32 1, %s1039_s22  ;;  %s62_s27 = sadd.s32 1, %s1031_s20 }
   0xf   : > { %p53_p0 = scmp.ge.s32.totalorder %s51_s26, 2  ;;  %p69_p1 = scmp.ne.s32.totalorder %s1031_s20, %s1027_s19 }
  0x10   : > { %p70_p2 = scmp.eq.s32.totalorder %s1043_s23, 0  ;;  %p75_p3 = scmp.ne.s32.totalorder %s1027_s19, %s1023_s18 }
  0x11   : > { %s1317_s26 = smov (%p53_p0, %s51_s26), 0  ;;  %p229_p5 = scmp.eq.s32.totalorder %s1110_s24, 1 }
  0x12   : > { %1296 = sst [smem:[#allocation19_spill]] %s1317_s26  ;;  %p1122_p4 = por %p70_p2, %p69_p1 }
  0x13   : > { %s55_s29 = ssub.s32 %s1039_s22, %s1317_s26  ;;  %p235_p6 = scmp.eq.s32.totalorder %s722_s25, 1 }
  0x14   : > { %p60_p7 = scmp.eq.s32.totalorder %s55_s29, 0  ;;  %p1129_p8 = por %p229_p5, %p69_p1 }
  0x15   : > { %p1136_p9 = por %p235_p6, %p75_p3  ;;  %p726_p10 = scmp.ge.s32.totalorder %s1043_s23, 2 }
  0x16   : > { %s1141_s7 = scalar_select %p60_p7, %s1031_s20, %s62_s27  }
  0x17   : > { %s1299_s6 = scalar_select %p1136_p9, 1, 0 }
  0x18   : > { %1301 = sst [smem:[#allocation21_spill]] %s1141_s7  ;;  %p777_p11 = scmp.lt.s32.totalorder %s1043_s23, 2 }
  0x19   : > { %1300 = sst [smem:[#allocation20_spill]] %s1299_s6  ;;  %s1286_s8 = sand.u32 1, %s1031_s20  }
  0x1a   : > { %s1147_s9 = sshll.u32 %s1039_s22, 3  ;;  %s1151_s10 = sshll.u32 %s1286_s8, 3 }
  0x1b   : > { %p1155_p12 = pnand %p777_p11, %p1122_p4  ;;  %s300_s12 = sand.u32 1, %s1043_s23  }
  0x1c   : > { %s1303_s1 = sld [smem:[#allocation22_spill]]  ;;  %s304_s16 = scalar_lea.vmem [#allocation7], %s1151_s10 }
  0x1d   : > { %s317_s17 = sshll.u32 %s304_s16, 4  ;;  %s1165_s27 = scalar_lea.sflag [#allocation8], %s300_s12  ;;  %s318_s17 = int_to_ptr.vmem [resolvable:$true] %s317_s17 }
  0x1e   : > { %p76_p13 = scmp.eq.s32.totalorder %s1110_s24, 0  ;;  %p723_p0 = scmp.ge.s32.totalorder %s1043_s23, 1 }
  0x1f   : > { %p242_p1 = scmp.lt.s32.totalorder %s1043_s23, 3  ;;  %s1305_s3 = sld [smem:[#allocation23_spill]] }
  0x20   : > { %p1178_p2 = por %p76_p13, %p75_p3  ;;  %s289_s29 = scalar_lea.hbm %s1280_s0, %s1147_s9 }
  0x21   : > { %p1185_p4 = pnand %p723_p0, %p242_p1  ;;  %s291_s13 = sshll.u32 %s289_s29, 4  ;;  %s292_s13 = int_to_ptr.hbm [resolvable:$true] %s291_s13 }
  0x22   : > { %s313_s15 = scalar_lea.hbm %s1303_s1, %s1147_s9  ;;  %s1046_s8 = smov 128  }
  0x23   : > { %s315_s25 = sshll.u32 %s313_s15, 4  ;;  %p758_p5 = pneg %p1185_p4  ;;  %s316_s25 = int_to_ptr.hbm [resolvable:$true] %s315_s25 }
  0x24   : > { %768 = dma.hbm_to_vmem [thread:$0]  (!%p1155_p12), %s316_s25, 128, %s318_s17, %s1165_s27  }
  0x25   : > { %s257_s14 = sshll.u32 %s1305_s3, 4  ;;  %s1045_s15 = smov [#allocation10]   ;;  %s258_s14 = int_to_ptr.hbm [resolvable:$true] %s257_s14 }
  0x26   : > { %s259_s16 = sshll.u32 %s1045_s15, 4  ;;  %p759_p3 = pnand %p758_p5, %p76_p13  ;;  %s260_s16 = int_to_ptr.vmem [resolvable:$true] %s259_s16 }
  0x27   : > { %s1047_s1 = smov 8   ;;  %s283_s3 = scalar_lea.vmem [#allocation4], %s1151_s10 }
  0x28   : > { %761 = dma.hbm_to_vmem [thread:$0]  (!%p759_p3), %s258_s14, 1536, %s260_s16, [#allocation11], %s1046_s8, %s1046_s8, %s1047_s1  }
  0x29   : > { %s293_s26 = sshll.u32 %s283_s3, 4  ;;  %s1307_s22 = sand.u32 1, %s1031_s20   ;;  %s294_s26 = int_to_ptr.vmem [resolvable:$true] %s293_s26 }
  0x2a   : > { %s280_s7 = scalar_lea.sflag [#allocation5], %s1307_s22  ;;  %s337_s6 = scalar_lea.hbm %s1282_s2, %s1147_s9 }
  0x2b   : > { %765 = dma.hbm_to_vmem [thread:$0]  (!%p1155_p12), %s292_s13, 128, %s294_s26, %s280_s7  }
  0x2c   : > { %s328_s17 = scalar_lea.vmem [#allocation9], %s1151_s10  ;;  %s339_s29 = sshll.u32 %s337_s6, 4  ;;  %s340_s29 = int_to_ptr.hbm [resolvable:$true] %s339_s29 }
  0x2d   : > { %s341_s25 = sshll.u32 %s328_s17, 4  ;;  %350 = sbr.rel (%p1185_p4) target bundleno = 207 (0xcf), region = 40  ;;  %s342_s25 = int_to_ptr.vmem [resolvable:$true] %s341_s25 }
  0x2e   : > { %771 = dma.hbm_to_vmem [thread:$0]  (!%p1155_p12), %s340_s29, 128, %s342_s25, %s1165_s27  }
  0x2f   : > { %s1213_s1 = sand.u32 (!%p1185_p4), 1, %s1027_s19  }
  0x30   : > { %s734_s3 = sshll.u32 (!%p1185_p4), %s1213_s1, 3  ;;  %s353_s22 = scalar_lea.sflag (!%p1185_p4), [#allocation5], %s1213_s1 }
  0x31   : > { %s356_s23 = scalar_lea.vmem (!%p1185_p4), [#allocation4], %s734_s3 }
  0x32   : > { %1006 = dma.done.wait (%p1178_p2), %s353_s22, 128  }
  0x33   : > { %1008 = vsyncadd (%p1178_p2), %s353_s22, 4294967168  ;;  %s362_s26 = sand.u32 1, %s1110_s24  }
  0x34   : > { %s363_s6 = scalar_lea.sflag [#allocation8], %s362_s26 }
  0x35   : > { %1010 = dma.done.wait (%p1178_p2), %s363_s6, 256  }
  0x36   : > { %1012 = vsyncadd (%p1178_p2), %s363_s6, 4294967040 }
  0x37   : > { %1014 = dma.done.wait (%p76_p13), [#allocation11], 1536  }
  0x38   : > { %1016 = vsyncadd (%p76_p13), [#allocation11], 4294965760  ;;  %vm433_vm0 = vcmask 261120   ;;  %v1048_v0 = vmov 0.0   ;;  %v511_v1 = vld [vmem:[#allocation10 + $0x58] sm:$0xff]  ;;  %v510_v2 = vld [vmem:[#allocation10 + $0x50] sm:$0xff] }
  0x39   : > { %441 = vst.msk [vmem:[#allocation3] sm:$0xff] %vm433_vm0, %v1048_v0  ;;  %v459_v3 = vld [vmem:[#allocation10 + $0x38] sm:$0xff]  ;;  %527 = vmatpush.msra.mxu2 %v511_v1  ;;  %v458_v5 = vld [vmem:[#allocation10 + $0x30] sm:$0xff]  ;;  %v509_v6 = vld [vmem:[#allocation10 + $0x48] sm:$0xff]  ;;  %s743_s24 = sshll.u32 %s1035_s21, 3  ;;  %s421_s27 = scalar_lea.vmem [#allocation12], %s734_s3 }
  0x3a   : > { %475 = vmatpush.msra.mxu0 %v459_v3  ;;  %v453_v4 = vld [vmem:[#allocation10 + $0x18] sm:$0xff]  ;;  %v452_v7 = vld [vmem:[#allocation10 + $0x10] sm:$0xff]  ;;  %v457_v9 = vld [vmem:[#allocation10 + $0x28] sm:$0xff]  ;;  %s555_s9 = scalar_lea.hbm %s1285_s5, %s743_s24  ;;  %s557_s28 = sshll.u32 %s421_s27, 4  ;;  %s558_s28 = int_to_ptr.vmem [resolvable:$true] %s557_s28 }
  0x3b   : > { %498 = vmatpush.msra.mxu1 %v453_v4  ;;  %v432_v8 = vld [vmem:[%s356_s23] sm:$0xff]  ;;  %528 = vmatpush.msra.mxu2 %v510_v2  ;;  %v451_v10 = vld [vmem:[#allocation10 + $0x8] sm:$0xff]  ;;  %v508_v11 = vld [vmem:[#allocation10 + $0x40] sm:$0xff]  ;;  %s559_s14 = sshll.u32 %s555_s9, 4  ;;  %s543_s21 = scalar_lea.sflag [#allocation6], %s1213_s1  ;;  %s560_s14 = int_to_ptr.hbm [resolvable:$true] %s559_s14 }
  0x3c   : > { %476 = vmatpush.msra.mxu0 %v458_v5  ;;  %434 = vst.msk [vmem:[#allocation3 + $0x8] sm:$0xff] %vm433_vm0, %v432_v8  ;;  %v456_v12 = vld [vmem:[#allocation10 + $0x20] sm:$0xff]  ;;  %v832_v20 = vld [vmem:[%s1284_s4] ss:$0 sm:$0xff]  ;;  %s967_s12 = sshra.s32 %s560_s14, 4  ;;  %s973_s17 = scalar_lea.hbm %s1285_s5, 16  ;;  %s968_s12 = int_to_ptr.hbm [resolvable:$true] %s967_s12 }
  0x3d   : > { %499 = vmatpush.msra.mxu1 %v452_v7  ;;  %529 = vmatpush.msra.mxu2 %v509_v6  ;;  %v450_v13 = vld [vmem:[#allocation10] sm:$0xff]  ;;  %s969_s16 = scalar_lea.hbm %s968_s12, 8  ;;  %p974_p12 = scmp.lt.s32.totalorder %s968_s12, %s1285_s5 }
  0x3e   : > { %477 = vmatpush.msra.mxu0 %v457_v9  ;;  %p970_p6 = scmp.ne.s32.totalorder %s968_s12, %s969_s16  ;;  %p975_p13 = scmp.lt.s32.totalorder %s973_s17, %s969_s16 }
  0x3f   : > { %500 = vmatpush.msra.mxu1 %v451_v10  ;;  %530 = vmatpush.msra.mxu2 %v508_v11 }
  0x40   : > { %478 = vmatpush.msra.mxu0 %v456_v12  ;;  %p971_p7 = pnand %p970_p6, %p1129_p8  ;;  %p976_p0 = por %p975_p13, %p974_p12 }
  0x41   : > { %501 = vmatpush.msra.mxu1 %v450_v13 }
  0x42   : > { %p972_p11 = pneg %p971_p7 }
  0x43   : > { %v506_v14 = vld [vmem:[#allocation3 + $0x8] sm:$0xff] }
  0x44   : > { %v454_v15 = vld [vmem:[#allocation3 + $0x7] sm:$0xff]  ;;  %741 = vmatmul.msk.f32.vlgmr.msra.gmra.mxu2 %vm433_vm0, %v506_v14  ;;  %p977_p1 = pnand %p976_p0, %p972_p11 }
  0x45   : > { %v449_v16 = vld [vmem:[#allocation3 + $0x6] sm:$0xff]  ;;  %739 = vmatmul.msk.f32.vlgmr.msra.gmra.mxu0 %vm433_vm0, %v454_v15 }
  0x46   : > { %740 = vmatmul.msk.f32.vlgmr.msra.gmra.mxu1 %vm433_vm0, %v449_v16 }
  0xc2   : > { %v480_v17 = vpop.f32.mrf.mxu0 }
  0xc3   : > { %v503_v18 = vpop.f32.mrf.mxu1 }
  0xc4   : > { %v504_v19 = vadd.f32 %v503_v18, %v480_v17 }
  0xc7   : > { %v532_v21 = vpop.f32.mrf.mxu2 }
  0xc8   : > { %v535_v22 = vadd.f32 %v532_v21, %v504_v19 }
  0xca   : > { %v540_v23 = vadd.f32 %v832_v20, %v535_v22 }
  0xcc   : > { %541 = vst [vmem:[%s421_s27] sm:$0xff] %v540_v23 }
  0xcd   : > { %980 = shalt.err (!%p977_p1)
}
  0xce   : > { %756 = dma.vmem_to_hbm [thread:$0]  (%p1129_p8), %s558_s28, 128, %s560_s14, %s543_s21  }
  0xcf PF: > { %s1309_s3 = sld [smem:[#allocation18_spill]]  ;;  %s571_s22 = sand.u32 1, %s1023_s18  }
  0xd0   : > { %p773_p2 = pnand %p726_p10, %p1136_p9  ;;  %s572_s23 = scalar_lea.sflag [#allocation6], %s571_s22 }
  0xd2   : > { %p774_p4 = pneg %p773_p2 }
  0xd4   : > { %1018 = dma.done.wait (%p774_p4), %s572_s23, 128  }
  0xd5   : > { %1020 = vsyncadd (%p774_p4), %s572_s23, 4294967168  ;;  %s25_s23 = sadd.s32 1, %s1309_s3   ;;  %s1310_s26 = sld [smem:[#allocation21_spill]] }
  0xd6   : > { %p22_p5 = scmp.ge.s32.totalorder %s25_s23, 4   ;;  %s1311_s21 = sld [smem:[#allocation17_spill]] }
  0xd7   : > { %s1312_s22 = sld [smem:[#allocation19_spill]]  ;;  %s1313_s18 = smov %s1027_s19 }
  0xd8   : > { %s1314_s19 = smov %s1031_s20  ;;  %24 = sbr.rel (!%p22_p5) target bundleno = 12 (0xc), region = 119 }
  0xdb   : > { %s1315_s20 = smov %s1310_s26 }
  0xdd   :  { %578 = vsyncpa [#allocation5], 1 }
  0xde   :  { %580 = vsyncpa [#allocation5 + $0x1], 1 }
  0xdf   :  { %581 = vsyncpa [#allocation8], 1 }
  0xe0   :  { %583 = vsyncpa [#allocation8 + $0x1], 1 }
  0xe1   :  { %584 = vsyncpa [#allocation11], 1 }
  0xe2   :  { %585 = vsyncpa [#allocation6], 1 }
  0xe3   :  { %587 = vsyncpa [#allocation6 + $0x1], 1 }

</bundles_post_ra>
